<compile_context>
chip_gen: v7x
topology: tpu7x:2x2x1
jax: 0.10.0
libtpu: 0.0.40
codegen_flags: <defaults>
</compile_context>

<pallas_src>
import jax
import jax.numpy as jnp
from jax.experimental import pallas as pl
from jax.experimental.pallas import tpu as pltpu


def _round_up(v, m):
    return (v + m - 1) // m * m


def _lora_qlinear_kernel(x_ref, w_ref, scale_ref, bias_ref, a_ref, b_ref,
                         o_ref, acc_ref, xa_ref):
    """One (i, j, k) grid step; k (reduction over K) is innermost.

    x_ref     : (TM, TK) bf16   activation tile
    w_ref     : (TK, TN) int8   pre-transposed quantized weight tile (int8 through DMA)
    scale_ref : (1,  TN) f32    per-output-channel dequant scale (lane-dense row)
    bias_ref  : (1,  TN) f32    bias row
    a_ref     : (Kp, r)  bf16   whole lora_a^T, VMEM-resident (constant block index)
    b_ref     : (r,  TN) bf16   lora_b^T tile with lora_scale pre-folded
    acc_ref   : (TM, TN) f32    base-matmul accumulator (scratch, persists across grid)
    xa_ref    : (TM, r)  f32    x @ lora_a^T accumulator (scratch, persists across grid)
    """
    j = pl.program_id(1)
    k = pl.program_id(2)

    @pl.when(k == 0)
    def _init_acc():
        acc_ref[...] = jnp.zeros_like(acc_ref)

    @pl.when(jnp.logical_and(j == 0, k == 0))
    def _init_xa():
        xa_ref[...] = jnp.zeros_like(xa_ref)

    x = x_ref[...]                                    # bf16, MXU-native
    w = w_ref[...].astype(jnp.bfloat16)               # int8 -> bf16 (exact for |v| <= 127)
    acc_ref[...] += jnp.dot(x, w, preferred_element_type=jnp.float32)

    # LoRA-A partial is independent of j: compute only on the first N tile and reuse
    # the persistent scratch for j > 0 (j axis is "arbitrary", never split across cores).
    @pl.when(j == 0)
    def _lora_a_partial():
        tk = x_ref.shape[1]
        start = pl.multiple_of(k * tk, tk)
        a_blk = a_ref[pl.ds(start, tk), :]
        xa_ref[...] += jnp.dot(x, a_blk, preferred_element_type=jnp.float32)

    @pl.when(k == pl.num_programs(2) - 1)
    def _finalize():
        # Per-N-channel dequant scale commutes with the K sum -> applied once here.
        # Accumulate in place to avoid fresh (TM, TN) f32 temporaries.
        acc_ref[...] = acc_ref[...] * scale_ref[...] + bias_ref[...]
        acc_ref[...] += jnp.dot(xa_ref[...].astype(jnp.bfloat16), b_ref[...],
                                preferred_element_type=jnp.float32)
        o_ref[...] = acc_ref[...].astype(o_ref.dtype)


def prepare_lora_qlinear(weight, weight_scale, bias, lora_a, lora_b, lora_scale,
                         *, tn=2048, tk=1024):
    """Once-per-weight preprocessing.  Call once and reuse the result across forwards:
    transposes/pads the int8 weight, folds lora_scale into lora_b^T, and lays out the
    per-channel scale/bias as lane-dense rows.  This keeps the per-call wrapper from
    re-streaming the whole weight through HBM on every forward."""
    N, K = weight.shape
    r = lora_a.shape[0]

    tn = min(tn, _round_up(N, 128))
    tk = min(tk, _round_up(K, 128))
    Np, Kp = _round_up(N, tn), _round_up(K, tk)

    w_t = jnp.pad(weight.T, ((0, Kp - K), (0, Np - N)))                            # (Kp, Np) int8
    a_t = jnp.pad(lora_a.astype(jnp.bfloat16).T, ((0, Kp - K), (0, 0)))            # (Kp, r)  bf16
    b_t = jnp.pad((lora_b.astype(jnp.float32).T * float(lora_scale)).astype(jnp.bfloat16),
                  ((0, 0), (0, Np - N)))                                           # (r, Np)  bf16
    scale_row = jnp.pad(weight_scale.astype(jnp.float32).reshape(1, N),
                        ((0, 0), (0, Np - N)))                                     # (1, Np)  f32
    if bias is None:
        bias_row = jnp.zeros((1, Np), jnp.float32)
    else:
        bias_row = jnp.pad(bias.astype(jnp.float32).reshape(1, N), ((0, 0), (0, Np - N)))

    return dict(w_t=w_t, a_t=a_t, b_t=b_t, scale_row=scale_row, bias_row=bias_row,
                N=N, K=K, r=r, Np=Np, Kp=Kp, tn=tn, tk=tk)


def lora_quantized_linear(x, prep, *, tm=512, out_dtype=jnp.bfloat16):
    """x: (..., K) fp16/bf16/f32; prep: result of prepare_lora_qlinear.
    Returns (..., N) in out_dtype (bf16 by default: the TPU-native 16-bit type)."""
    lead = x.shape[:-1]
    K = x.shape[-1]
    assert K == prep["K"], "only weight_bit_width == 8 is supported"
    N, r = prep["N"], prep["r"]
    Np, Kp, tn, tk = prep["Np"], prep["Kp"], prep["tn"], prep["tk"]

    M = 1
    for d in lead:
        M *= d

    tm = min(tm, _round_up(M, 8))
    Mp = _round_up(M, tm)

    x2 = x.reshape(M, K).astype(jnp.bfloat16)         # fp16 -> bf16 once at the boundary
    x2 = jnp.pad(x2, ((0, Mp - M), (0, Kp - K)))      # zero pad is neutral for the K sum

    grid = (Mp // tm, Np // tn, Kp // tk)

    out = pl.pallas_call(
        _lora_qlinear_kernel,
        out_shape=jax.ShapeDtypeStruct((Mp, Np), out_dtype),
        grid_spec=pltpu.PrefetchScalarGridSpec(
            num_scalar_prefetch=0,
            grid=grid,
            in_specs=[
                pl.BlockSpec((tm, tk), lambda i, j, k: (i, k)),     # activations
                pl.BlockSpec((tk, tn), lambda i, j, k: (k, j)),     # int8 W^T
                pl.BlockSpec((1, tn), lambda i, j, k: (0, j)),      # dequant scale row
                pl.BlockSpec((1, tn), lambda i, j, k: (0, j)),      # bias row
                pl.BlockSpec((Kp, r), lambda i, j, k: (0, 0)),      # lora_a^T, VMEM-resident
                pl.BlockSpec((r, tn), lambda i, j, k: (0, j)),      # lora_b^T * lora_scale
            ],
            out_specs=pl.BlockSpec((tm, tn), lambda i, j, k: (i, j)),
            scratch_shapes=[
                pltpu.VMEM((tm, tn), jnp.float32),   # base accumulator
                pltpu.VMEM((tm, r), jnp.float32),    # x @ lora_a^T accumulator
            ],
        ),
        compiler_params=pltpu.CompilerParams(
            # j and k must be "arbitrary": k is the reduction; j must not be sharded
            # across TensorCores because the LoRA-A partial is only computed at j == 0.
            dimension_semantics=("parallel", "arbitrary", "arbitrary"),
            vmem_limit_bytes=40 * 1024 * 1024,       # v7x-safe (64 MiB physical per TC)
        ),
    )(x2, prep["w_t"], prep["scale_row"], prep["bias_row"], prep["a_t"], prep["b_t"])

    return out[:M, :N].reshape(*lead, N)


def _reference(x, weight, weight_scale, bias, lora_a, lora_b, lora_scale):
    xf = x.astype(jnp.float32).reshape(-1, x.shape[-1])
    w = weight.astype(jnp.float32) * weight_scale.astype(jnp.float32)[:, None]
    base = xf @ w.T + bias.astype(jnp.float32)[None, :]
    lora = (xf @ lora_a.astype(jnp.float32).T) @ lora_b.astype(jnp.float32).T * lora_scale
    return (base + lora).reshape(x.shape[:-1] + (weight.shape[0],))


if __name__ == "__main__":
    # Small, module-consistent shapes.
    batch, seq = 2, 8
    in_dim, out_dim = 64, 128
    lora_r, lora_alpha = 32, 16
    lora_scale = lora_alpha / lora_r  # 0.5

    key = jax.random.PRNGKey(0)
    k_x, k_w, k_s, k_b, k_a, k_lb = jax.random.split(key, 6)

    x = jax.random.normal(k_x, (batch, seq, in_dim), dtype=jnp.float32).astype(jnp.float16)
    # int8 quantized weight + positive per-channel half scale (as in QuantizedLinear).
    weight = jax.random.randint(k_w, (out_dim, in_dim), -127, 128, dtype=jnp.int32).astype(jnp.int8)
    weight_scale = (jax.random.uniform(k_s, (out_dim,), minval=0.01, maxval=0.05)
                    ).astype(jnp.float16)
    bias = jax.random.normal(k_b, (out_dim,), dtype=jnp.float32).astype(jnp.float16)
    # lora_a: kaiming_normal_ (fan_in = in_dim, gain = sqrt(2)).
    lora_a = (jax.random.normal(k_a, (lora_r, in_dim), dtype=jnp.float32)
              * jnp.sqrt(2.0 / in_dim)).astype(jnp.float16)
    # Module inits lora_b to zeros; use small nonzero values so the LoRA path is exercised.
    lora_b = (0.02 * jax.random.normal(k_lb, (out_dim, lora_r), dtype=jnp.float32)
              ).astype(jnp.float16)

    # Once-per-weight preprocessing, then the forward.
    prep = prepare_lora_qlinear(weight, weight_scale, bias, lora_a, lora_b, lora_scale)
    out = lora_quantized_linear(x, prep)
    out = jax.block_until_ready(out)

    ref = _reference(x, weight, weight_scale, bias, lora_a, lora_b, lora_scale)
    assert out.shape == (batch, seq, out_dim)

    out_f = out.astype(jnp.float32)
    err = jnp.abs(out_f - ref)
    # Tolerance model: activations run through the MXU in bf16 (fp16->bf16 drops 3 mantissa
    # bits) with f32 accumulation, and the output is bf16.  The absolute error therefore
    # scales with the magnitude of the accumulated terms, not with the (possibly cancelled)
    # per-element output, so use an atol proportional to the output's dynamic range plus a
    # small rtol, and additionally require a tight global relative error.
    ref_max = float(jnp.max(jnp.abs(ref)))
    tol = 2e-2 * ref_max + 2e-2 * jnp.abs(ref)
    max_err = float(jnp.max(err))
    assert bool(jnp.all(err <= tol)), f"elementwise mismatch: max_err={max_err}, ref_max={ref_max}"
    rel_fro = float(jnp.linalg.norm(out_f - ref) / jnp.linalg.norm(ref))
    assert rel_fro < 1e-2, f"global relative error too large: {rel_fro}"

    print("KERNEL_OK")
</pallas_src>

<mosaic_0001>
module attributes {stable_mosaic.version = 11 : i64} {
  func.func @_lora_qlinear_kernel(%arg0: i32, %arg1: i32, %arg2: i32, %arg3: memref<16x128xbf16, #tpu.memory_space<vmem>>, %arg4: memref<128x128xi8, #tpu.memory_space<vmem>>, %arg5: memref<1x128xf32, #tpu.memory_space<vmem>>, %arg6: memref<1x128xf32, #tpu.memory_space<vmem>>, %arg7: memref<128x32xbf16, #tpu.memory_space<vmem>>, %arg8: memref<32x128xbf16, #tpu.memory_space<vmem>>, %arg9: memref<16x128xbf16, #tpu.memory_space<vmem>>, %arg10: memref<16x128xf32, #tpu.memory_space<vmem>>, %arg11: memref<16x32xf32, #tpu.memory_space<vmem>>) attributes {dimension_semantics = [#tpu.dimension_semantics<parallel>, #tpu.dimension_semantics<arbitrary>, #tpu.dimension_semantics<arbitrary>], iteration_bounds = array<i64: 1, 1, 1>, scalar_prefetch = 0 : i64, scratch_operands = 2 : i64, tpu.core_type = #tpu.core_type<tc>, window_params = [{transform_indices = @transform_0, window_bounds = array<i64: 16, 128>}, {transform_indices = @transform_1, window_bounds = array<i64: 128, 128>}, {transform_indices = @transform_2, window_bounds = array<i64: 1, 128>}, {transform_indices = @transform_3, window_bounds = array<i64: 1, 128>}, {pipeline_mode = #tpu.pipeline_mode<synchronous>, transform_indices = @transform_4, window_bounds = array<i64: 128, 32>}, {transform_indices = @transform_5, window_bounds = array<i64: 32, 128>}, {transform_indices = @transform_6, window_bounds = array<i64: 16, 128>}]} {
    %c0_i32 = arith.constant 0 : i32
    %0 = arith.cmpi eq, %arg2, %c0_i32 : i32
    %1 = arith.extui %0 : i1 to i32
    %c0_i32_0 = arith.constant 0 : i32
    %2 = arith.cmpi ne, %1, %c0_i32_0 : i32
    scf.if %2 {
      %cst_15 = arith.constant 0.000000e+00 : f32
      %21 = vector.broadcast %cst_15 : f32 to vector<16x128xf32>
      %c0_16 = arith.constant 0 : index
      %c0_17 = arith.constant 0 : index
      %22 = vector.load %arg10[%c0_16, %c0_17] : memref<16x128xf32, #tpu.memory_space<vmem>>, vector<16x128xf32>
      tpu.vector_store %arg10[%c0_16, %c0_17], %21 {strides = array<i32>} : memref<16x128xf32, #tpu.memory_space<vmem>>, vector<16x128xf32>,
    } else {
    }
    %c0_i32_1 = arith.constant 0 : i32
    %3 = arith.cmpi eq, %arg1, %c0_i32_1 : i32
    %c0_i32_2 = arith.constant 0 : i32
    %4 = arith.cmpi eq, %arg2, %c0_i32_2 : i32
    %5 = arith.andi %3, %4 : i1
    %6 = arith.extui %5 : i1 to i32
    %c0_i32_3 = arith.constant 0 : i32
    %7 = arith.cmpi ne, %6, %c0_i32_3 : i32
    scf.if %7 {
      %cst_15 = arith.constant 0.000000e+00 : f32
      %21 = vector.broadcast %cst_15 : f32 to vector<16x32xf32>
      %c0_16 = arith.constant 0 : index
      %c0_17 = arith.constant 0 : index
      %22 = vector.load %arg11[%c0_16, %c0_17] : memref<16x32xf32, #tpu.memory_space<vmem>>, vector<16x32xf32>
      tpu.vector_store %arg11[%c0_16, %c0_17], %21 {strides = array<i32>} : memref<16x32xf32, #tpu.memory_space<vmem>>, vector<16x32xf32>,
    } else {
    }
    %c0 = arith.constant 0 : index
    %c0_4 = arith.constant 0 : index
    %8 = vector.load %arg3[%c0, %c0_4] : memref<16x128xbf16, #tpu.memory_space<vmem>>, vector<16x128xbf16>
    %c0_5 = arith.constant 0 : index
    %c0_6 = arith.constant 0 : index
    %9 = vector.load %arg4[%c0_5, %c0_6] : memref<128x128xi8, #tpu.memory_space<vmem>>, vector<128x128xi8>
    %10 = arith.sitofp %9 : vector<128x128xi8> to vector<128x128xbf16>
    %c0_7 = arith.constant 0 : index
    %c0_8 = arith.constant 0 : index
    %11 = vector.load %arg10[%c0_7, %c0_8] : memref<16x128xf32, #tpu.memory_space<vmem>>, vector<16x128xf32>
    %cst = arith.constant dense<0.000000e+00> : vector<16x128xf32>
    %12 = tpu.matmul %8, %10, %cst {dimension_numbers = #tpu.dot_dimension_numbers<[1], [0], [0], [1], [0, 0, 1, 1], [], []>} : vector<16x128xbf16>, vector<128x128xbf16>, vector<16x128xf32> -> vector<16x128xf32>
    %13 = arith.addf %11, %12 : vector<16x128xf32>
    %c0_9 = arith.constant 0 : index
    %c0_10 = arith.constant 0 : index
    %14 = vector.load %arg10[%c0_9, %c0_10] : memref<16x128xf32, #tpu.memory_space<vmem>>, vector<16x128xf32>
    tpu.vector_store %arg10[%c0_9, %c0_10], %13 {strides = array<i32>} : memref<16x128xf32, #tpu.memory_space<vmem>>, vector<16x128xf32>,
    %c0_i32_11 = arith.constant 0 : i32
    %15 = arith.cmpi eq, %arg1, %c0_i32_11 : i32
    %16 = arith.extui %15 : i1 to i32
    %c0_i32_12 = arith.constant 0 : i32
    %17 = arith.cmpi ne, %16, %c0_i32_12 : i32
    scf.if %17 {
      %c128_i32 = arith.constant 128 : i32
      %21 = arith.muli %arg2, %c128_i32 : i32
      %22 = tpu.assume_multiple %21, 128 : i32
      %23 = arith.index_cast %22 : i32 to index
      %c0_15 = arith.constant 0 : index
      %24 = vector.load %arg7[%23, %c0_15] : memref<128x32xbf16, #tpu.memory_space<vmem>>, vector<128x32xbf16>
      %c0_16 = arith.constant 0 : index
      %c0_17 = arith.constant 0 : index
      %25 = vector.load %arg11[%c0_16, %c0_17] : memref<16x32xf32, #tpu.memory_space<vmem>>, vector<16x32xf32>
      %cst_18 = arith.constant dense<0.000000e+00> : vector<16x32xf32>
      %26 = tpu.matmul %8, %24, %cst_18 {dimension_numbers = #tpu.dot_dimension_numbers<[1], [0], [0], [1], [0, 0, 1, 1], [], []>} : vector<16x128xbf16>, vector<128x32xbf16>, vector<16x32xf32> -> vector<16x32xf32>
      %27 = arith.addf %25, %26 : vector<16x32xf32>
      %c0_19 = arith.constant 0 : index
      %c0_20 = arith.constant 0 : index
      %28 = vector.load %arg11[%c0_19, %c0_20] : memref<16x32xf32, #tpu.memory_space<vmem>>, vector<16x32xf32>
      tpu.vector_store %arg11[%c0_19, %c0_20], %27 {strides = array<i32>} : memref<16x32xf32, #tpu.memory_space<vmem>>, vector<16x32xf32>,
    } else {
    }
    %c0_i32_13 = arith.constant 0 : i32
    %18 = arith.cmpi eq, %arg2, %c0_i32_13 : i32
    %19 = arith.extui %18 : i1 to i32
    %c0_i32_14 = arith.constant 0 : i32
    %20 = arith.cmpi ne, %19, %c0_i32_14 : i32
    scf.if %20 {
      %c0_15 = arith.constant 0 : index
      %c0_16 = arith.constant 0 : index
      %21 = vector.load %arg10[%c0_15, %c0_16] : memref<16x128xf32, #tpu.memory_space<vmem>>, vector<16x128xf32>
      %c0_17 = arith.constant 0 : index
      %c0_18 = arith.constant 0 : index
      %22 = vector.load %arg5[%c0_17, %c0_18] : memref<1x128xf32, #tpu.memory_space<vmem>>, vector<1x128xf32>
      %23 = vector.broadcast %22 : vector<1x128xf32> to vector<16x128xf32>
      %24 = arith.mulf %21, %23 : vector<16x128xf32>
      %c0_19 = arith.constant 0 : index
      %c0_20 = arith.constant 0 : index
      %25 = vector.load %arg6[%c0_19, %c0_20] : memref<1x128xf32, #tpu.memory_space<vmem>>, vector<1x128xf32>
      %26 = vector.broadcast %25 : vector<1x128xf32> to vector<16x128xf32>
      %27 = arith.addf %24, %26 : vector<16x128xf32>
      %c0_21 = arith.constant 0 : index
      %c0_22 = arith.constant 0 : index
      %28 = vector.load %arg10[%c0_21, %c0_22] : memref<16x128xf32, #tpu.memory_space<vmem>>, vector<16x128xf32>
      tpu.vector_store %arg10[%c0_21, %c0_22], %27 {strides = array<i32>} : memref<16x128xf32, #tpu.memory_space<vmem>>, vector<16x128xf32>,
      %c0_23 = arith.constant 0 : index
      %c0_24 = arith.constant 0 : index
      %29 = vector.load %arg10[%c0_23, %c0_24] : memref<16x128xf32, #tpu.memory_space<vmem>>, vector<16x128xf32>
      %c0_25 = arith.constant 0 : index
      %c0_26 = arith.constant 0 : index
      %30 = vector.load %arg11[%c0_25, %c0_26] : memref<16x32xf32, #tpu.memory_space<vmem>>, vector<16x32xf32>
      %31 = arith.truncf %30 : vector<16x32xf32> to vector<16x32xbf16>
      %c0_27 = arith.constant 0 : index
      %c0_28 = arith.constant 0 : index
      %32 = vector.load %arg8[%c0_27, %c0_28] : memref<32x128xbf16, #tpu.memory_space<vmem>>, vector<32x128xbf16>
      %cst_29 = arith.constant dense<0.000000e+00> : vector<16x128xf32>
      %33 = tpu.matmul %31, %32, %cst_29 {dimension_numbers = #tpu.dot_dimension_numbers<[1], [0], [0], [1], [0, 0, 1, 1], [], []>} : vector<16x32xbf16>, vector<32x128xbf16>, vector<16x128xf32> -> vector<16x128xf32>
      %34 = arith.addf %29, %33 : vector<16x128xf32>
      %c0_30 = arith.constant 0 : index
      %c0_31 = arith.constant 0 : index
      %35 = vector.load %arg10[%c0_30, %c0_31] : memref<16x128xf32, #tpu.memory_space<vmem>>, vector<16x128xf32>
      tpu.vector_store %arg10[%c0_30, %c0_31], %34 {strides = array<i32>} : memref<16x128xf32, #tpu.memory_space<vmem>>, vector<16x128xf32>,
      %c0_32 = arith.constant 0 : index
      %c0_33 = arith.constant 0 : index
      %36 = vector.load %arg10[%c0_32, %c0_33] : memref<16x128xf32, #tpu.memory_space<vmem>>, vector<16x128xf32>
      %37 = arith.truncf %36 : vector<16x128xf32> to vector<16x128xbf16>
      %c0_34 = arith.constant 0 : index
      %c0_35 = arith.constant 0 : index
      %38 = vector.load %arg9[%c0_34, %c0_35] : memref<16x128xbf16, #tpu.memory_space<vmem>>, vector<16x128xbf16>
      tpu.vector_store %arg9[%c0_34, %c0_35], %37 {strides = array<i32>} : memref<16x128xbf16, #tpu.memory_space<vmem>>, vector<16x128xbf16>,
    } else {
    }
    return
  }
  func.func @transform_0(%arg0: i32, %arg1: i32, %arg2: i32) -> (i32, i32) {
    %c0_i32 = arith.constant 0 : i32
    return %arg0, %arg2 : i32, i32
  }
  func.func @transform_1(%arg0: i32, %arg1: i32, %arg2: i32) -> (i32, i32) {
    %c0_i32 = arith.constant 0 : i32
    return %arg2, %arg1 : i32, i32
  }
  func.func @transform_2(%arg0: i32, %arg1: i32, %arg2: i32) -> (i32, i32) {
    %c0_i32 = arith.constant 0 : i32
    %c0_i32_0 = arith.constant 0 : i32
    return %c0_i32, %arg1 : i32, i32
  }
  func.func @transform_3(%arg0: i32, %arg1: i32, %arg2: i32) -> (i32, i32) {
    %c0_i32 = arith.constant 0 : i32
    %c0_i32_0 = arith.constant 0 : i32
    return %c0_i32, %arg1 : i32, i32
  }
  func.func @transform_4(%arg0: i32, %arg1: i32, %arg2: i32) -> (i32, i32) {
    %c0_i32 = arith.constant 0 : i32
    %c0_i32_0 = arith.constant 0 : i32
    %c0_i32_1 = arith.constant 0 : i32
    return %c0_i32, %c0_i32_0 : i32, i32
  }
  func.func @transform_5(%arg0: i32, %arg1: i32, %arg2: i32) -> (i32, i32) {
    %c0_i32 = arith.constant 0 : i32
    %c0_i32_0 = arith.constant 0 : i32
    return %c0_i32, %arg1 : i32, i32
  }
  func.func @transform_6(%arg0: i32, %arg1: i32, %arg2: i32) -> (i32, i32) {
    %c0_i32 = arith.constant 0 : i32
    return %arg0, %arg1 : i32, i32
  }
}

</mosaic_0001>

<bundles_post_ra>
// kernel: tpu_custom_call.1
= control target key start
LH: loop header
LB: loop body
LE: loop exit
PB: predicated region body
PF: predicated region fallthrough
CT: control target
= control target key end

     0   :  { %v483_v1 = vmov 0.0   ;;  %vm484_vm0 = vmmov 0   ;;  %vm36_vm1 = vcmask 261120   ;;  %s617_s0 = inlined_call_operand.vmem [shape: bf16[16,128], index: 0, kind: input, shape index: {}]   ;;  %s618_s1 = inlined_call_operand.vmem [shape: s8[128,128], index: 1, kind: input, shape index: {}]   ;;  %s619_s2 = inlined_call_operand.vmem [shape: f32[1,128], index: 2, kind: input, shape index: {}]   ;;  %s620_s3 = inlined_call_operand.vmem [shape: f32[1,128], index: 3, kind: input, shape index: {}]   ;;  %s621_s4 = inlined_call_operand.vmem [shape: bf16[128,32], index: 4, kind: input, shape index: {}]   ;;  %s622_s5 = inlined_call_operand.vmem [shape: bf16[32,128], index: 5, kind: input, shape index: {}]   ;;  %s623_s6 = inlined_call_operand.hbm [shape: bf16[16,128], index: 6, kind: output, shape index: {}]  }
   0x1   :  { %v448_v0 = vld [vmem:[%s621_s4] sm:$0xff]   ;;  %415 = vmatprep.subr.bf16.mxu1 %v483_v1  ;;  %395 = vmatprep.subr.bf16.mxu0 %v483_v1  ;;  %v449_v2 = vld [vmem:[%s621_s4 + $0x8] sm:$0xff]   ;;  %37 = vst.msk [vmem:[#allocation3] sm:$0xff] %vm36_vm1, %v483_v1  ;;  %38 = vst.msk [vmem:[#allocation3 + $0x8] sm:$0xff] %vm36_vm1, %v483_v1 }
   0x2   :  { %416 = vmatpush3.bf16.msra.mxu1 %v448_v0  ;;  %431 = vmatprep.mubr.msk.bf16.mxu1 %vm484_vm0, %v483_v1  ;;  %v450_v3 = vld [vmem:[%s621_s4 + $0x10] sm:$0xff]   ;;  %v41_v4 = vld [vmem:[%s618_s1] sm:$0xff]  ;;  %v451_v5 = vld [vmem:[%s621_s4 + $0x18] sm:$0xff]  }
   0x3   :  { %417 = vmatprep.subr.bf16.mxu1 %v483_v1  ;;  %411 = vmatprep.mubr.msk.bf16.mxu0 %vm484_vm0, %v483_v1  ;;  %v45_v6 = vunpack.c.l.s8.bf16 %v41_v4  ;;  %v46_v7 = vunpack.c.h.s8.bf16 %v41_v4 }
   0x5   :  { %396 = vmatpush3.bf16.msra.mxu0 %v45_v6 }
   0x6   :  { %418 = vmatpush3.bf16.msra.mxu1 %v449_v2 }
   0x7   :  { %419 = vmatprep.subr.bf16.mxu1 %v483_v1 }
   0xa   :  { %420 = vmatpush3.bf16.msra.mxu1 %v450_v3 }
   0xb   :  { %421 = vmatprep.subr.bf16.mxu1 %v483_v1 }
   0xc   :  { %11 = vsyncpa [#allocation5], 0  ;;  %397 = vmatprep.subr.bf16.mxu0 %v483_v1  ;;  %v42_v8 = vld [vmem:[%s618_s1 + $0x8] sm:$0xff]  ;;  %v452_v9 = vld [vmem:[%s621_s4 + $0x20] sm:$0xff]   ;;  %s485_s27 = smov [#allocation4]  }
   0xd   :  { %398 = vmatpush3.bf16.msra.mxu0 %v46_v7  ;;  %v47_v10 = vunpack.c.l.s8.bf16 %v42_v8  ;;  %v453_v11 = vld [vmem:[%s621_s4 + $0x28] sm:$0xff]   ;;  %v48_v12 = vunpack.c.h.s8.bf16 %v42_v8  ;;  %v43_v13 = vld [vmem:[%s618_s1 + $0x10] sm:$0xff]  ;;  %v455_v16 = vld [vmem:[%s621_s4 + $0x38] sm:$0xff]   ;;  %s338_s28 = sshll.u32 %s485_s27, 4  ;;  %s339_s28 = int_to_ptr.vmem [resolvable:$true] %s338_s28 }
   0xe   :  { %422 = vmatpush3.bf16.msra.mxu1 %v451_v5  ;;  %399 = vmatprep.subr.bf16.mxu0 %v483_v1  ;;  %v454_v14 = vld [vmem:[%s621_s4 + $0x30] sm:$0xff]   ;;  %v49_v15 = vunpack.c.l.s8.bf16 %v43_v13  ;;  %v50_v17 = vunpack.c.h.s8.bf16 %v43_v13  ;;  %v456_v18 = vld [vmem:[%s617_s0] sm:$0xff]   ;;  %v44_v19 = vld [vmem:[%s618_s1 + $0x18] sm:$0xff]  ;;  %p464_p1 = scmp.lt.s32.totalorder %s339_s28, %s339_s28 }
   0xf   :  { %423 = vmatprep.subr.bf16.mxu1 %v483_v1  ;;  %v51_v20 = vunpack.c.l.s8.bf16 %v44_v19  ;;  %v52_v21 = vunpack.c.h.s8.bf16 %v44_v19  ;;  %v457_v22 = vld [vmem:[%s622_s5] sm:$0xff]   ;;  %v458_v23 = vld [vmem:[%s622_s5 + $0x8] sm:$0xff]  }
  0x10   :  { %v130_v24 = vld [vmem:[#allocation3] sm:$0xff]  ;;  %v131_v26 = vld [vmem:[#allocation3 + $0x8] sm:$0xff] }
  0x11   :  { %400 = vmatpush3.bf16.msra.mxu0 %v47_v10  ;;  %v360_v39 = vld [vmem:[%s619_s2] ss:$0 sm:$0xff]  ;;  %s459_s2 = scalar_lea.vmem %s339_s28, 128 }
  0x12   :  { %424 = vmatpush3.bf16.msra.mxu1 %v452_v9  ;;  %401 = vmatprep.subr.bf16.mxu0 %v483_v1  ;;  %v361_v41 = vld [vmem:[%s620_s3] ss:$0 sm:$0xff]  ;;  %p460_p0 = scmp.ne.s32.totalorder %s339_s28, %s459_s2  ;;  %p465_p2 = scmp.lt.s32.totalorder %s459_s2, %s459_s2 }
  0x13   :  { %425 = vmatprep.subr.bf16.mxu1 %v483_v1 }
  0x14   :  { %p466_p3 = por %p465_p2, %p464_p1 }
  0x15   :  { %402 = vmatpush3.bf16.msra.mxu0 %v48_v12 }
  0x16   :  { %426 = vmatpush3.bf16.msra.mxu1 %v453_v11  ;;  %403 = vmatprep.subr.bf16.mxu0 %v483_v1  ;;  %p467_p4 = pnand %p466_p3, %p460_p0 }
  0x17   :  { %427 = vmatprep.subr.bf16.mxu1 %v483_v1 }
  0x19   :  { %404 = vmatpush3.bf16.msra.mxu0 %v49_v15 }
  0x1a   :  { %428 = vmatpush3.bf16.msra.mxu1 %v454_v14  ;;  %405 = vmatprep.subr.bf16.mxu0 %v483_v1 }
  0x1b   :  { %429 = vmatprep.subr.bf16.mxu1 %v483_v1 }
  0x1d   :  { %406 = vmatpush3.bf16.msra.mxu0 %v50_v17 }
  0x1e   :  { %430 = vmatpush3.bf16.msra.mxu1 %v455_v16  ;;  %407 = vmatprep.subr.bf16.mxu0 %v483_v1 }
  0x21   :  { %432 = vmatmul.mubr.bf16.vlgmr.msra.gmra.mrb[0].mxu1 %v456_v18  ;;  %408 = vmatpush3.bf16.msra.mxu0 %v51_v20 }
  0x22   :  { %409 = vmatprep.subr.bf16.mxu0 %v483_v1 }
  0x25   :  { %410 = vmatpush3.bf16.msra.mxu0 %v52_v21 }
  0x26   :  { %435 = vmatprep.subr.bf16.mxu0 %v483_v1 }
  0x28   :  { %412 = vmatmul.mubr.bf16.vlgmr.msra.gmra.mrb[0].mxu0 %v456_v18 }
  0x29   :  { %439 = vmatprep.mubr.msk.bf16.mxu0 %vm484_vm0, %v483_v1  ;;  %436 = vmatpush3.bf16.msra.mxu0 %v457_v22 }
  0x2a   :  { %437 = vmatprep.subr.bf16.mxu0 %v483_v1 }
  0x2d   :  { %438 = vmatpush3.bf16.msra.mxu0 %v458_v23 }
  0xf4   :  { %v214_v25 = vpop.f32.mrb[0].mxu1 }
  0xf5   :  { %v221_v27 = vadd.f32 %v214_v25, %v130_v24  ;;  %v433_v28 = vpop.f32.mrb[1].mxu1 }
  0xf6   :  { %v217_v29 = vpop.f32.mrb[2].mxu1 }
  0xf7   :  { %224 = vst.msk [vmem:[#allocation3] sm:$0xff] %vm36_vm1, %v221_v27  ;;  %v222_v30 = vadd.f32 %v217_v29, %v131_v26  ;;  %v434_v31 = vpop.f32.mrb[3].mxu1 }
  0xf9   :  { %225 = vst.msk [vmem:[#allocation3 + $0x8] sm:$0xff] %vm36_vm1, %v222_v30 }
  0xfb   :  { %v95_v35 = vpop.f32.mrb[0].mxu0 }
  0xfc   :  { %v413_v36 = vpop.f32.mrb[1].mxu0  ;;  %v238_v40 = vmul.f32 %v360_v39, %v95_v35 }
  0xfd   :  { %v98_v37 = vpop.f32.mrb[2].mxu0 }
  0xfe   :  { %v253_v32 = vld [vmem:[#allocation3] sm:$0xff]  ;;  %v414_v38 = vpop.f32.mrb[3].mxu0  ;;  %v239_v42 = vmul.f32 %v360_v39, %v98_v37  ;;  %v247_v43 = vadd.f32 %v361_v41, %v238_v40 }
 0x100   :  { %v254_v33 = vld [vmem:[#allocation3 + $0x8] sm:$0xff]  ;;  %v248_v47 = vadd.f32 %v361_v41, %v239_v42 }
 0x101   :  { %v255_v34 = vpack.c.bf16 %v254_v33, %v253_v32 }
 0x103   :  { %440 = vmatmul.mubr.msk.bf16.vlgmr.msra.gmra.mrb[4].mxu0 %vm36_vm1, %v255_v34 }
 0x1d6   :  { %v310_v44 = vpop.f32.mrb[4].mxu0 }
 0x1d7   :  { %v317_v45 = vadd.f32 %v310_v44, %v247_v43  ;;  %v441_v46 = vpop.f32.mrb[5].mxu0 }
 0x1d8   :  { %v313_v48 = vpop.f32.mrb[6].mxu0 }
 0x1d9   :  { %v318_v49 = vadd.f32 %v313_v48, %v248_v47  ;;  %v442_v50 = vpop.f32.mrb[7].mxu0 }
 0x1db   :  { %v372_v51 = vpack.c.bf16 %v318_v49, %v317_v45 }
 0x1dd   :  { %373 = vst [vmem:[#allocation4] sm:$0xff] %v372_v51  }
 0x1de   :  { %470 = shalt.err (!%p467_p4)
}
 0x1df   :  { %s471_s30 = scalar_lea.hbm %s623_s6, 128 }
 0x1e0   :  { %p472_p5 = scmp.ne.s32.totalorder %s623_s6, %s471_s30  ;;  %p475_p6 = scmp.lt.u32.totalorder %s471_s30, %s623_s6 }
 0x1e2   :  { %p477_p7 = pnand %p475_p6, %p472_p5 }
 0x1e4   :  { %480 = shalt.err (!%p477_p7)
}
 0x1e5   :  { %s486_s11 = smov 64   ;;  %s487_s12 = smov 4  }
 0x1e6   :  { %344 = dma.vmem_to_hbm [thread:$0]  %s339_s28, 128, %s623_s6, [#allocation5], %s486_s11, %s486_s11, %s487_s12  }
 0x1e7   :  { %481 = dma.done.wait [#allocation5], 128  }
 0x1e8   :  { %482 = vsyncadd [#allocation5], 4294967168 }
 0x1e9   :  { %348 = vsyncpa [#allocation5], 1 }

</bundles_post_ra>
